<compile_context>
chip_gen: v7x
topology: tpu7x:2x2x1
jax: 0.10.0
libtpu: 0.0.40
codegen_flags: <defaults>
</compile_context>

<pallas_src>
import functools

import jax
import jax.numpy as jnp
from jax.experimental import pallas as pl
from jax.experimental.pallas import tpu as pltpu


# ---------------------------------------------------------------------------
# Kernels
# ---------------------------------------------------------------------------
def _rsoftmax_kernel(x_ref, o_ref, *, radix, cardinality, r):
    """Softmax over radix groups for one lane-dense (tile_b, n) block.

    x_ref holds the natural (cardinality, radix, r) flat order; o_ref is written in
    the PyTorch transpose-then-flatten (radix, cardinality, r) order.
    """
    feat = cardinality * r                       # lane stride of the radix axis in o_ref
    for c in range(cardinality):                 # static, tiny loops
        base = c * radix * r
        xs = [x_ref[:, base + k * r: base + (k + 1) * r].astype(jnp.float32)
              for k in range(radix)]
        m = xs[0]
        for xk in xs[1:]:
            m = jnp.maximum(m, xk)               # per-group max (VPU)
        es = [jnp.exp(xk - m) for xk in xs]      # EUP
        s = es[0]
        for ek in es[1:]:
            s = s + ek                           # per-group sum
        for k in range(radix):
            # Direct sliced store into the transposed output position; no
            # concatenate, no transposed intermediate, exact division.
            lo = k * feat + c * r
            o_ref[:, lo: lo + r] = (es[k] / s).astype(o_ref.dtype)


def _sigmoid_kernel(x_ref, o_ref):
    o_ref[...] = jax.nn.sigmoid(x_ref[...].astype(jnp.float32)).astype(o_ref.dtype)


# ---------------------------------------------------------------------------
# Tiling helpers
# ---------------------------------------------------------------------------
def _num_tensorcores():
    """Best-effort TensorCore count of the local chip (2 on v4/v5p/v7x)."""
    try:
        dev = jax.devices()[0]
        if dev.platform != "tpu":
            return 1
        kind = getattr(dev, "device_kind", "").lower().replace(" ", "")
        if any(tag in kind for tag in ("v7", "v5p", "v4")):
            return 2
    except Exception:
        pass
    return 1


def _pick_tile_b(batch, n, itemsize, num_cores):
    """Batch-tile size for a lane-dense (tile_b, n) block.

    Budgets against the *lane-padded* block footprint (what VMEM actually holds),
    keeps tile_b a sublane multiple so full tiles load/store unmasked, and only
    forces a >=2-step grid when the chip has 2 TensorCores.
    """
    lane_n = pl.cdiv(n, 128) * 128
    row_bytes = lane_n * itemsize
    sub = 8 if itemsize >= 4 else (16 if itemsize == 2 else 32)
    # Per-block-buffer budget: in + out blocks, each double-buffered, stays far
    # below scoped-VMEM defaults on every generation (v7x has only 64 MiB physical,
    # so use the smaller ceiling there).
    budget = (2 << 20) if num_cores > 1 else (4 << 20)
    tile = max(1, min(batch, budget // max(row_bytes, 1), 1024))
    if num_cores > 1 and tile == batch and batch >= 2 * sub:
        tile = pl.cdiv(batch, 2)                 # give both TensorCores a grid step
    if tile < batch:
        tile = max(sub, (tile // sub) * sub)     # sublane-aligned full tiles
        tile = min(tile, batch)
    return int(tile)


# ---------------------------------------------------------------------------
# Public wrapper
# ---------------------------------------------------------------------------
def rsoftmax(x, radix: int, cardinality: int):
    """Pallas TPU implementation of rSoftMax.forward.

    x: (B, C, *spatial) in the PyTorch NC(L) convention.
    radix > 1  -> returns (B, C*prod(spatial)), matching reshape(batch, -1).
    radix == 1 -> returns sigmoid(x) with x's original shape.
    """
    itemsize = jnp.dtype(x.dtype).itemsize
    num_cores = _num_tensorcores()

    if radix > 1:
        batch = x.shape[0]
        x2 = x.reshape(batch, -1)                # free reshape, natural flat order
        n = x2.shape[1]
        group = cardinality * radix
        if n % group != 0:
            raise ValueError(
                f"Flattened feature size {n} is not divisible by "
                f"cardinality*radix = {group}.")
        r = n // group

        tile_b = _pick_tile_b(batch, n, itemsize, num_cores)
        grid = (pl.cdiv(batch, tile_b),)
        lane_n = pl.cdiv(n, 128) * 128
        cost = pl.CostEstimate(
            flops=4 * batch * n,                 # max / sub / add / normalize
            transcendentals=2 * batch * n,       # exp + divide (EUP)
            bytes_accessed=2 * batch * lane_n * itemsize,
        )
        kernel = functools.partial(
            _rsoftmax_kernel, radix=radix, cardinality=cardinality, r=r)
        out = pl.pallas_call(
            kernel,
            out_shape=jax.ShapeDtypeStruct((batch, n), x2.dtype),
            grid=grid,
            in_specs=[pl.BlockSpec((tile_b, n), lambda b: (b, 0))],
            out_specs=pl.BlockSpec((tile_b, n), lambda b: (b, 0)),
            compiler_params=pltpu.CompilerParams(
                dimension_semantics=("parallel",)),
            cost_estimate=cost,
        )(x2)
        return out                               # already in (radix, card, r) order

    # ---- radix == 1: elementwise sigmoid, shape preserved --------------------
    total = int(x.size)
    flat = None
    for cols in (2048, 1024, 512, 256, 128):     # lane-dense re-blocking if possible
        if total % cols == 0:
            flat = x.reshape(total // cols, cols)
            break
    if flat is None:
        flat = x.reshape(x.shape[0], -1)
    rows, cols = flat.shape
    tile_r = _pick_tile_b(rows, cols, itemsize, num_cores)
    grid = (pl.cdiv(rows, tile_r),)
    lane_c = pl.cdiv(cols, 128) * 128
    cost = pl.CostEstimate(
        flops=2 * total,
        transcendentals=total,
        bytes_accessed=2 * rows * lane_c * itemsize,
    )
    out = pl.pallas_call(
        _sigmoid_kernel,
        out_shape=jax.ShapeDtypeStruct((rows, cols), flat.dtype),
        grid=grid,
        in_specs=[pl.BlockSpec((tile_r, cols), lambda b: (b, 0))],
        out_specs=pl.BlockSpec((tile_r, cols), lambda b: (b, 0)),
        compiler_params=pltpu.CompilerParams(
            dimension_semantics=("parallel",)),
        cost_estimate=cost,
    )(flat)
    return out.reshape(x.shape)


# ---------------------------------------------------------------------------
# Pure-JAX reference
# ---------------------------------------------------------------------------
def _ref_rsoftmax(x, radix, cardinality):
    batch = x.shape[0]
    if radix > 1:
        xt = x.reshape(batch, cardinality, radix, -1).transpose(0, 2, 1, 3)
        return jax.nn.softmax(xt, axis=1).reshape(batch, -1)
    return jax.nn.sigmoid(x)


if __name__ == "__main__":
    key = jax.random.PRNGKey(0)
    k1, k2, k3 = jax.random.split(key, 3)

    # Typical ResNeSt attention logits: (B, channels*radix, 1), radix=2, card=1.
    radix, cardinality = 2, 1
    x = jax.random.normal(k1, (2, cardinality * radix * 128, 1), dtype=jnp.float32)
    y = jax.block_until_ready(rsoftmax(x, radix, cardinality))
    y_ref = _ref_rsoftmax(x, radix, cardinality)
    assert y.shape == (2, 256)
    assert jnp.allclose(y, y_ref, atol=1e-5, rtol=1e-5), float(jnp.max(jnp.abs(y - y_ref)))

    # cardinality > 1: exercises the in-kernel (card, radix) -> (radix, card) permute.
    radix2, card2 = 4, 2
    x2 = jax.random.normal(k2, (2, card2 * radix2 * 8, 1), dtype=jnp.float32)
    y2 = jax.block_until_ready(rsoftmax(x2, radix2, card2))
    y2_ref = _ref_rsoftmax(x2, radix2, card2)
    assert y2.shape == (2, 64)
    assert jnp.allclose(y2, y2_ref, atol=1e-5, rtol=1e-5), float(jnp.max(jnp.abs(y2 - y2_ref)))

    # radix == 1 path (sigmoid, shape preserved).
    x3 = jax.random.normal(k3, (2, 16, 1), dtype=jnp.float32)
    y3 = jax.block_until_ready(rsoftmax(x3, 1, card2))
    assert y3.shape == x3.shape
    assert jnp.allclose(y3, jax.nn.sigmoid(x3), atol=1e-5, rtol=1e-5)

    print("KERNEL_OK")
</pallas_src>

<mosaic_0001>
module attributes {stable_mosaic.version = 11 : i64} {
  func.func @_rsoftmax_kernel(%arg0: i32, %arg1: memref<2x256xf32, #tpu.memory_space<vmem>>, %arg2: memref<2x256xf32, #tpu.memory_space<vmem>>) attributes {dimension_semantics = [#tpu.dimension_semantics<parallel>], iteration_bounds = array<i64: 1>, scalar_prefetch = 0 : i64, scratch_operands = 0 : i64, tpu.core_type = #tpu.core_type<tc>, window_params = [{transform_indices = @transform_0, window_bounds = array<i64: 2, 256>}, {transform_indices = @transform_1, window_bounds = array<i64: 2, 256>}]} {
    %c0 = arith.constant 0 : index
    %c0_0 = arith.constant 0 : index
    %0 = vector.load %arg1[%c0, %c0_0] : memref<2x256xf32, #tpu.memory_space<vmem>>, vector<2x128xf32>
    %c0_1 = arith.constant 0 : index
    %c128 = arith.constant 128 : index
    %1 = vector.load %arg1[%c0_1, %c128] : memref<2x256xf32, #tpu.memory_space<vmem>>, vector<2x128xf32>
    %2 = arith.maximumf %0, %1 : vector<2x128xf32>
    %3 = arith.subf %0, %2 : vector<2x128xf32>
    %4 = math.exp %3 : vector<2x128xf32>
    %5 = arith.subf %1, %2 : vector<2x128xf32>
    %6 = math.exp %5 : vector<2x128xf32>
    %7 = arith.addf %4, %6 : vector<2x128xf32>
    %8 = arith.divf %4, %7 : vector<2x128xf32>
    %c0_2 = arith.constant 0 : index
    %c0_3 = arith.constant 0 : index
    %9 = vector.load %arg2[%c0_2, %c0_3] : memref<2x256xf32, #tpu.memory_space<vmem>>, vector<2x128xf32>
    tpu.vector_store %arg2[%c0_2, %c0_3], %8 {strides = array<i32>} : memref<2x256xf32, #tpu.memory_space<vmem>>, vector<2x128xf32>,
    %10 = arith.divf %6, %7 : vector<2x128xf32>
    %c0_4 = arith.constant 0 : index
    %c128_5 = arith.constant 128 : index
    %11 = vector.load %arg2[%c0_4, %c128_5] : memref<2x256xf32, #tpu.memory_space<vmem>>, vector<2x128xf32>
    tpu.vector_store %arg2[%c0_4, %c128_5], %10 {strides = array<i32>} : memref<2x256xf32, #tpu.memory_space<vmem>>, vector<2x128xf32>,
    return
  }
  func.func @transform_0(%arg0: i32) -> (i32, i32) {
    %c0_i32 = arith.constant 0 : i32
    %c0_i32_0 = arith.constant 0 : i32
    return %arg0, %c0_i32 : i32, i32
  }
  func.func @transform_1(%arg0: i32) -> (i32, i32) {
    %c0_i32 = arith.constant 0 : i32
    %c0_i32_0 = arith.constant 0 : i32
    return %arg0, %c0_i32 : i32, i32
  }
}

</mosaic_0001>

<bundles_post_ra>
// kernel: tpu_custom_call.1
= control target key start
LH: loop header
LB: loop body
LE: loop exit
PB: predicated region body
PF: predicated region fallthrough
CT: control target
= control target key end

     0   :  { %6 = vsyncpa [#allocation3], 0  ;;  %s143_s0 = inlined_call_operand.hbm [shape: f32[2,256], index: 0, kind: input, shape index: {}]   ;;  %s144_s1 = inlined_call_operand.hbm [shape: f32[2,256], index: 1, kind: output, shape index: {}]  }
   0x1   :  { %7 = vsyncpa [#allocation4], 0  ;;  %s107_s6 = smov [#allocation2]   ;;  %s59_s10 = scalar_lea.hbm %s143_s0, 64 }
   0x2   :  { %s14_s7 = sshll.u32 %s107_s6, 4  ;;  %p60_p0 = scmp.ne.s32.totalorder %s143_s0, %s59_s10  ;;  %s15_s7 = int_to_ptr.vmem [resolvable:$true] %s14_s7 }
   0x3   :  { %p63_p1 = scmp.lt.u32.totalorder %s59_s10, %s143_s0 }
   0x5   :  { %p65_p2 = pnand %p63_p1, %p60_p0 }
   0x7   :  { %68 = shalt.err (!%p65_p2)
}
   0x8   :  { %s69_s15 = scalar_lea.vmem %s15_s7, 64  ;;  %p74_p4 = scmp.lt.s32.totalorder %s15_s7, %s15_s7 }
   0x9   :  { %p70_p3 = scmp.ne.s32.totalorder %s15_s7, %s69_s15  ;;  %p75_p5 = scmp.lt.s32.totalorder %s69_s15, %s69_s15 }
   0xb   :  { %p76_p6 = por %p75_p5, %p74_p4 }
   0xd   :  { %p77_p7 = pnand %p76_p6, %p70_p3 }
   0xf   :  { %80 = shalt.err (!%p77_p7)
}
  0x10   :  { %17 = dma.hbm_to_vmem [thread:$0]  %s143_s0, 64, %s15_s7, [#allocation3]  }
  0x11   :  { %103 = dma.done.wait [#allocation3], 64  }
  0x12   :  { %104 = vsyncadd [#allocation3], 4294967232  ;;  %v21_v0 = vld [vmem:[#allocation2] sm:$0x3]  ;;  %v22_v1 = vld [vmem:[#allocation2 + $0x2] sm:$0x3] }
  0x13   :  { %v23_v2 = vmax.f32 %v21_v0, %v22_v1  ;;  %s108_s18 = smov [#allocation5]  }
  0x14   :  { %s42_s19 = sshll.u32 %s108_s18, 4  ;;  %s43_s19 = int_to_ptr.vmem [resolvable:$true] %s42_s19 }
  0x15   :  { %v24_v3 = vsub.f32 %v21_v0, %v23_v2  ;;  %v27_v4 = vsub.f32 %v22_v1, %v23_v2  ;;  %s81_s0 = scalar_lea.vmem %s43_s19, 64  ;;  %p86_p9 = scmp.lt.s32.totalorder %s43_s19, %s43_s19 }
  0x16   :  { %p82_p8 = scmp.ne.s32.totalorder %s43_s19, %s81_s0  ;;  %p87_p10 = scmp.lt.s32.totalorder %s81_s0, %s81_s0 }
  0x17   :  { %v25_v5 = vmul.f32 1.442695, %v24_v3  ;;  %v28_v6 = vmul.f32 1.442695, %v27_v4 }
  0x18   :  { %p88_p11 = por %p87_p10, %p86_p9 }
  0x19   :  { %53 = vpow2.f32 %v25_v5 }
  0x1a   :  { %55 = vpow2.f32 %v28_v6  ;;  %p89_p12 = pnand %p88_p11, %p82_p8 }
  0x23   :  { %v54_v7 = vpop.eup %53 }
  0x24   :  { %v56_v8 = vpop.eup %55 }
  0x25   :  { %v30_v9 = vadd.f32 %v56_v8, %v54_v7 }
  0x27   :  { %57 = vrcp.f32 %v30_v9 }
  0x31   :  { %v58_v10 = vpop.eup %57 }
  0x32   :  { %v32_v11 = vmul.f32 %v58_v10, %v54_v7  ;;  %v34_v12 = vmul.f32 %v58_v10, %v56_v8 }
  0x34   :  { %33 = vst [vmem:[#allocation5] sm:$0x3] %v32_v11  ;;  %35 = vst [vmem:[#allocation5 + $0x2] sm:$0x3] %v34_v12 }
  0x35   :  { %92 = shalt.err (!%p89_p12)
}
  0x36   :  { %s93_s22 = scalar_lea.hbm %s144_s1, 64 }
  0x37   :  { %p94_p13 = scmp.ne.s32.totalorder %s144_s1, %s93_s22  ;;  %p97_p0 = scmp.lt.u32.totalorder %s93_s22, %s144_s1 }
  0x39   :  { %p99_p1 = pnand %p97_p0, %p94_p13 }
  0x3b   :  { %102 = shalt.err (!%p99_p1)
}
  0x3c   :  { %45 = dma.vmem_to_hbm [thread:$0]  %s43_s19, 64, %s144_s1, [#allocation4]  }
  0x3d   :  { %105 = dma.done.wait [#allocation4], 64  }
  0x3e   :  { %106 = vsyncadd [#allocation4], 4294967232 }
  0x3f   :  { %49 = vsyncpa [#allocation3], 1 }
  0x40   :  { %50 = vsyncpa [#allocation4], 1 }

</bundles_post_ra>
